<compile_context>
chip_gen: v7x
topology: tpu7x:2x2x1
jax: 0.10.0
libtpu: 0.0.40
codegen_flags: <defaults>
</compile_context>

<pallas_src>
import functools
import math

import jax
import jax.numpy as jnp
import numpy as np
from jax.experimental import pallas as pl
from jax.experimental.pallas import tpu as pltpu

BN_EPS = 1e-5
L2_EPS = 1e-12


# --------------------------------------------------------------------------
# Hardware-derived sizing (v5e/v6e: 128 MiB VMEM -> big tiles; v7x: 64 MiB)
# --------------------------------------------------------------------------
@functools.lru_cache(maxsize=None)
def _vmem_config():
    try:
        cap = int(pltpu.get_tpu_info().vmem_capacity_bytes)
    except Exception:
        cap = 64 * 1024 * 1024              # conservative default (v7x per-TC)
    if cap >= 96 * 1024 * 1024:             # v5e / v6e (128 MiB physical)
        return {"vmem_limit": 100 * 1024 * 1024,
                "max_row_tile": 2048, "max_n_tile": 1024}
    return {"vmem_limit": 48 * 1024 * 1024,  # v7x: stay well under 64 MiB
            "max_row_tile": 1024, "max_n_tile": 512}


def _shrink_to_budget(tile, estimate_fn, budget):
    """Halve the tile (keeping a multiple of 8) until the VMEM estimate fits."""
    while tile > 8 and estimate_fn(tile) > budget:
        tile = max(8, ((tile // 2) // 8) * 8)
    return tile


# --------------------------------------------------------------------------
# Pass 1: BatchNorm statistics over all B*N rows of assignment = x @ clusters.
# Grid = (chunk, row-tile); each chunk accumulates a partial [sum; sumsq]
# block so the chunk axis can be "parallel" (v7x megacore).  The tiny
# mean/rstd combine happens in the wrapper.
# --------------------------------------------------------------------------
def _bn_stats_kernel(x_ref, clusters_ref, psum_ref, *, total_rows, tile_rows,
                     tiles_per_chunk, needs_mask):
    c = pl.program_id(0)
    i = pl.program_id(1)

    @pl.when(i == 0)
    def _init():
        psum_ref[...] = jnp.zeros_like(psum_ref)

    # bf16 MXU inputs, f32 accumulation.
    raw = jnp.dot(x_ref[...], clusters_ref[...],
                  preferred_element_type=jnp.float32)            # (TM, K)

    if needs_mask:                                               # static branch
        row = jax.lax.broadcasted_iota(jnp.int32, (tile_rows, 1), 0)
        global_row = (c * tiles_per_chunk + i) * tile_rows + row
        raw = jnp.where(global_row < total_rows, raw, jnp.zeros_like(raw))

    # TODO(synk): sum/sum-of-squares can cancel in f32 if |mean| >> std; fine
    # for the BN-on-logits use here, a per-column shift would harden it.
    psum_ref[0:1, :] += jnp.sum(raw, axis=0, keepdims=True)
    psum_ref[1:2, :] += jnp.sum(raw * raw, axis=0, keepdims=True)


# --------------------------------------------------------------------------
# Pass 2: per-batch fused assignment -> BN -> softmax -> a_sum / vlad -> norms.
# Grid = (B, N-tiles); vlad accumulates in lane-dense (K, D) f32 scratch.
# --------------------------------------------------------------------------
def _netvlad_main_kernel(stats_ref, x_ref, clusters_ref, clusters2_ref, out_ref,
                         vlad_acc, asum_acc, *, n_total, tile_n):
    nt = pl.program_id(1)
    num_nt = pl.num_programs(1)

    @pl.when(nt == 0)
    def _init():
        vlad_acc[...] = jnp.zeros_like(vlad_acc)
        asum_acc[...] = jnp.zeros_like(asum_acc)

    x = x_ref[...]                                               # (TN, D) bf16
    # assignment logits (bf16 MXU inputs, f32 accumulate)
    raw = jnp.dot(x, clusters_ref[...],
                  preferred_element_type=jnp.float32)            # (TN, K)

    # BatchNorm1d (train-mode stats from pass 1), then softmax over clusters.
    mean = stats_ref[0:1, :]
    rstd = stats_ref[1:2, :]
    z = (raw - mean) * rstd
    z_max = jnp.max(z, axis=-1, keepdims=True)
    e = jnp.exp(z - z_max)
    denom = jnp.sum(e, axis=-1, keepdims=True)
    assign = e * pl.reciprocal(denom, approx=True)               # (TN, K)

    # Only the cheap (TN, K) assign mask is needed: x was zero-padded in the
    # wrapper, so masked rows contribute exactly zero to a_sum and vlad.
    if (n_total % tile_n) != 0:                                  # static branch
        row = jax.lax.broadcasted_iota(jnp.int32, (tile_n, 1), 0)
        valid = (nt * tile_n + row) < n_total
        assign = jnp.where(valid, assign, jnp.zeros_like(assign))

    asum_acc[...] += jnp.sum(assign, axis=0, keepdims=True)      # (1, K)
    # vlad accumulated in lane-dense (K, D): contract the N axis of both
    # operands so the transposed MXU operand is the tiny (TN, K) assign.
    vlad_acc[...] += jax.lax.dot_general(
        assign.astype(jnp.bfloat16), x,
        dimension_numbers=(((0,), (0,)), ((), ())),
        preferred_element_type=jnp.float32)                      # (K, D)

    @pl.when(nt == num_nt - 1)
    def _finalize():
        a_col = jnp.swapaxes(asum_acc[...], 0, 1)                # (K, 1)
        vlad = vlad_acc[...] - a_col * clusters2_ref[...]        # (K, D)
        # intra-normalization over D, then global L2 over D*K, fused into one
        # broadcasted scale; lax.rsqrt = a single EUP op per norm.
        ss_d = jnp.sum(vlad * vlad, axis=-1, keepdims=True)      # (K, 1)
        inv1 = jax.lax.rsqrt(jnp.maximum(ss_d, L2_EPS * L2_EPS))
        ss_all = jnp.sum(ss_d * inv1 * inv1, keepdims=True)      # (1, 1)
        inv2 = jax.lax.rsqrt(jnp.maximum(ss_all, L2_EPS * L2_EPS))
        # lane-dense store: feature dim D (>=128) on the 128-lane axis.
        out_ref[...] = (vlad * (inv1 * inv2)).astype(out_ref.dtype)


# --------------------------------------------------------------------------
# Wrapper
# --------------------------------------------------------------------------
def netvlad_forward(x, clusters, clusters2):
    B, N, D = x.shape
    K = clusters.shape[1]
    rows = B * N

    cfg = _vmem_config()
    vmem_limit = cfg["vmem_limit"]
    budget = int(0.6 * vmem_limit)

    # bf16 for everything that only feeds the MXU (halves x HBM traffic too);
    # BN / softmax / normalization math stays in f32 inside the kernels.
    x_bf = x.astype(jnp.bfloat16)
    clusters_bf = clusters.astype(jnp.bfloat16)
    # clusters2 pre-transposed into the lane-dense (K, D) layout used in pass 2.
    clusters2_kd = jnp.swapaxes(clusters2.reshape(D, K), 0, 1).astype(jnp.float32)

    # ---- pass 1: BN batch statistics (2 "parallel" chunks for v7x megacore) ----
    def pass1_vmem(tm_):
        return (2 * tm_ * D * 2 + D * K * 2 + 2 * 2 * K * 4
                + 2 * tm_ * max(K, 128) * 4)

    tm = _shrink_to_budget(min(rows, cfg["max_row_tile"]), pass1_vmem, budget)
    num_mt = pl.cdiv(rows, tm)
    num_chunks = 2 if num_mt >= 2 else 1
    tpc = pl.cdiv(num_mt, num_chunks)
    needs_mask1 = (num_chunks * tpc * tm) != rows

    x2d = x_bf.reshape(rows, D)
    partial = pl.pallas_call(
        functools.partial(_bn_stats_kernel, total_rows=rows, tile_rows=tm,
                          tiles_per_chunk=tpc, needs_mask=needs_mask1),
        grid=(num_chunks, tpc),
        in_specs=[
            # clamp so a duplicated last tile (odd tile count) never DMAs OOB;
            # the in-kernel row mask zeroes its contribution.
            pl.BlockSpec((tm, D),
                         lambda c, i: (jnp.minimum(c * tpc + i, num_mt - 1), 0)),
            pl.BlockSpec((D, K), lambda c, i: (0, 0)),
        ],
        out_specs=pl.BlockSpec((None, 2, K), lambda c, i: (c, 0, 0)),
        out_shape=jax.ShapeDtypeStruct((num_chunks, 2, K), jnp.float32),
        compiler_params=pltpu.CompilerParams(
            dimension_semantics=("parallel", "arbitrary"),
            vmem_limit_bytes=vmem_limit),
    )(x2d, clusters_bf)

    # tiny cross-chunk combine (XLA): [sum; sumsq] -> [mean; rstd]
    s = jnp.sum(partial[:, 0, :], axis=0)
    sq = jnp.sum(partial[:, 1, :], axis=0)
    mean = s / rows
    var = jnp.maximum(sq / rows - mean * mean, 0.0)   # biased batch variance
    rstd = jax.lax.rsqrt(var + jnp.float32(BN_EPS))
    stats = jnp.stack([mean, rstd], axis=0)           # (2, K) f32

    # ---- pass 2: main NetVLAD kernel ----
    def pass2_vmem(tn_):
        return (2 * tn_ * D * 2                      # x tile, bf16, 2x buffered
                + 2 * K * D * 4                      # out block, f32, 2x buffered
                + D * K * 2 + K * D * 4 + 2 * K * 4  # clusters / clusters2 / stats
                + K * D * 4 + K * 4                  # accumulators
                + 6 * tn_ * max(K, 128) * 4)         # f32 softmax temporaries

    tn = _shrink_to_budget(min(N, cfg["max_n_tile"]), pass2_vmem, budget)
    num_nt = pl.cdiv(N, tn)
    n_pad = num_nt * tn
    if n_pad != N:
        # zero-pad N once so the kernel never needs the expensive (TN, D) x
        # mask; padded rows are finite and their assign rows are masked to 0.
        x_bf = jnp.pad(x_bf, ((0, 0), (0, n_pad - N), (0, 0)))

    out_kd = pl.pallas_call(
        functools.partial(_netvlad_main_kernel, n_total=N, tile_n=tn),
        grid=(B, num_nt),
        in_specs=[
            pl.BlockSpec((2, K), lambda b, n: (0, 0)),            # BN stats (f32)
            pl.BlockSpec((None, tn, D), lambda b, n: (b, n, 0)),  # x tile (bf16)
            pl.BlockSpec((D, K), lambda b, n: (0, 0)),            # clusters (bf16)
            pl.BlockSpec((K, D), lambda b, n: (0, 0)),            # clusters2^T (f32)
        ],
        out_specs=pl.BlockSpec((None, K, D), lambda b, n: (b, 0, 0)),
        out_shape=jax.ShapeDtypeStruct((B, K, D), jnp.float32),
        scratch_shapes=[
            pltpu.VMEM((K, D), jnp.float32),   # vlad accumulator (lane-dense)
            pltpu.VMEM((1, K), jnp.float32),   # a_sum accumulator
        ],
        compiler_params=pltpu.CompilerParams(
            dimension_semantics=("parallel", "arbitrary"),
            vmem_limit_bytes=vmem_limit),
    )(stats, x_bf, clusters_bf, clusters2_kd)

    # layout glue: (B, K, D) -> (B, D, K) -> (B, D*K); matches torch's
    # vlad.view(-1, cluster_size * feature_size) on the (B, D, K) tensor.
    return jnp.swapaxes(out_kd, 1, 2).reshape(B, D * K)


netvlad_forward_jit = jax.jit(netvlad_forward)


# --------------------------------------------------------------------------
# Pure-JAX reference mirroring the PyTorch forward (train-mode BN, f32 matmuls)
# --------------------------------------------------------------------------
def netvlad_reference(x, clusters, clusters2):
    B, N, D = x.shape
    K = clusters.shape[1]
    hp = jax.lax.Precision.HIGHEST
    xf = x.reshape(-1, D)
    assignment = jnp.dot(xf, clusters, precision=hp)          # (B*N, K)
    mean = jnp.mean(assignment, axis=0, keepdims=True)
    var = jnp.mean((assignment - mean) ** 2, axis=0, keepdims=True)
    assignment = (assignment - mean) / jnp.sqrt(var + BN_EPS)
    assignment = jax.nn.softmax(assignment, axis=1)
    assignment = assignment.reshape(B, N, K)
    a_sum = jnp.sum(assignment, axis=-2, keepdims=True)
    a = a_sum * clusters2
    vlad = jnp.matmul(jnp.swapaxes(assignment, 1, 2), x, precision=hp)  # (B, K, D)
    vlad = jnp.swapaxes(vlad, 1, 2) - a                       # (B, D, K)
    nrm = jnp.sqrt(jnp.sum(vlad * vlad, axis=1, keepdims=True))
    vlad = vlad / jnp.maximum(nrm, L2_EPS)
    vlad = vlad.reshape(B, D * K)
    nrm2 = jnp.sqrt(jnp.sum(vlad * vlad, axis=1, keepdims=True))
    return vlad / jnp.maximum(nrm2, L2_EPS)


if __name__ == "__main__":
    B, N = 2, 8                 # batch, max_sample
    feature_size = 128          # D (lane-aligned test size)
    cluster_size = 16           # K

    key = jax.random.PRNGKey(0)
    kx, kc, kc2 = jax.random.split(key, 3)

    scale = 1.0 / math.sqrt(feature_size)
    x = jax.random.normal(kx, (B, N, feature_size), dtype=jnp.float32)
    clusters = scale * jax.random.normal(
        kc, (feature_size, cluster_size), dtype=jnp.float32)
    clusters2 = scale * jax.random.normal(
        kc2, (1, feature_size, cluster_size), dtype=jnp.float32)

    out = jax.block_until_ready(netvlad_forward_jit(x, clusters, clusters2))
    ref = jax.block_until_ready(netvlad_reference(x, clusters, clusters2))

    assert out.shape == (B, cluster_size * feature_size)
    # Tolerance reflects the deliberate bf16 MXU inputs (f32 accumulation) and
    # the approximate softmax reciprocal; errors are ~1e-4 absolute on entries
    # that are O(0.02-0.1) after the double L2 normalization.
    np.testing.assert_allclose(np.asarray(out), np.asarray(ref),
                               rtol=2e-2, atol=2e-3)

    print("KERNEL_OK")
</pallas_src>

<mosaic_0001>
module attributes {stable_mosaic.version = 11 : i64} {
  func.func @_bn_stats_kernel(%arg0: i32, %arg1: i32, %arg2: memref<16x128xbf16, #tpu.memory_space<vmem>>, %arg3: memref<128x16xbf16, #tpu.memory_space<vmem>>, %arg4: memref<1x2x16xf32, #tpu.memory_space<vmem>>) attributes {dimension_semantics = [#tpu.dimension_semantics<parallel>, #tpu.dimension_semantics<arbitrary>], iteration_bounds = array<i64: 1, 1>, scalar_prefetch = 0 : i64, scratch_operands = 0 : i64, tpu.core_type = #tpu.core_type<tc>, window_params = [{transform_indices = @transform_0, window_bounds = array<i64: 16, 128>}, {pipeline_mode = #tpu.pipeline_mode<synchronous>, transform_indices = @transform_1, window_bounds = array<i64: 128, 16>}, {transform_indices = @transform_2, window_bounds = array<i64: 1, 2, 16>}]} {
    %c0_i32 = arith.constant 0 : i32
    %0 = arith.cmpi eq, %arg1, %c0_i32 : i32
    %1 = arith.extui %0 : i1 to i32
    %c0_i32_0 = arith.constant 0 : i32
    %2 = arith.cmpi ne, %1, %c0_i32_0 : i32
    scf.if %2 {
      %cst_17 = arith.constant 0.000000e+00 : f32
      %23 = vector.broadcast %cst_17 : f32 to vector<2x16xf32>
      %c0_18 = arith.constant 0 : index
      %c0_19 = arith.constant 0 : index
      %c0_20 = arith.constant 0 : index
      %24 = vector.load %arg4[%c0_18, %c0_19, %c0_20] : memref<1x2x16xf32, #tpu.memory_space<vmem>>, vector<1x2x16xf32>
      %25 = vector.shape_cast %24 : vector<1x2x16xf32> to vector<2x16xf32>
      %26 = vector.shape_cast %23 : vector<2x16xf32> to vector<1x2x16xf32>
      tpu.vector_store %arg4[%c0_18, %c0_19, %c0_20], %26 {strides = array<i32>} : memref<1x2x16xf32, #tpu.memory_space<vmem>>, vector<1x2x16xf32>,
    } else {
    }
    %c0 = arith.constant 0 : index
    %c0_1 = arith.constant 0 : index
    %3 = vector.load %arg2[%c0, %c0_1] : memref<16x128xbf16, #tpu.memory_space<vmem>>, vector<16x128xbf16>
    %c0_2 = arith.constant 0 : index
    %c0_3 = arith.constant 0 : index
    %4 = vector.load %arg3[%c0_2, %c0_3] : memref<128x16xbf16, #tpu.memory_space<vmem>>, vector<128x16xbf16>
    %cst = arith.constant dense<0.000000e+00> : vector<16x16xf32>
    %5 = tpu.matmul %3, %4, %cst {dimension_numbers = #tpu.dot_dimension_numbers<[1], [0], [0], [1], [0, 0, 1, 1], [], []>} : vector<16x128xbf16>, vector<128x16xbf16>, vector<16x16xf32> -> vector<16x16xf32>
    %c0_4 = arith.constant 0 : index
    %c0_5 = arith.constant 0 : index
    %c0_6 = arith.constant 0 : index
    %6 = vector.load %arg4[%c0_4, %c0_5, %c0_6] : memref<1x2x16xf32, #tpu.memory_space<vmem>>, vector<1x1x16xf32>
    %7 = vector.shape_cast %6 : vector<1x1x16xf32> to vector<1x16xf32>
    %cst_7 = arith.constant dense<0.000000e+00> : vector<16xf32>
    %8 = vector.multi_reduction <add>, %5, %cst_7 [0] : vector<16x16xf32> to vector<16xf32>
    %9 = vector.shape_cast %8 : vector<16xf32> to vector<1x16xf32>
    %10 = arith.addf %7, %9 : vector<1x16xf32>
    %c0_8 = arith.constant 0 : index
    %c0_9 = arith.constant 0 : index
    %c0_10 = arith.constant 0 : index
    %11 = vector.load %arg4[%c0_8, %c0_9, %c0_10] : memref<1x2x16xf32, #tpu.memory_space<vmem>>, vector<1x1x16xf32>
    %12 = vector.shape_cast %11 : vector<1x1x16xf32> to vector<1x16xf32>
    %13 = vector.shape_cast %10 : vector<1x16xf32> to vector<1x1x16xf32>
    tpu.vector_store %arg4[%c0_8, %c0_9, %c0_10], %13 {strides = array<i32>} : memref<1x2x16xf32, #tpu.memory_space<vmem>>, vector<1x1x16xf32>,
    %c0_11 = arith.constant 0 : index
    %c1 = arith.constant 1 : index
    %c0_12 = arith.constant 0 : index
    %14 = vector.load %arg4[%c0_11, %c1, %c0_12] : memref<1x2x16xf32, #tpu.memory_space<vmem>>, vector<1x1x16xf32>
    %15 = vector.shape_cast %14 : vector<1x1x16xf32> to vector<1x16xf32>
    %16 = arith.mulf %5, %5 : vector<16x16xf32>
    %cst_13 = arith.constant dense<0.000000e+00> : vector<16xf32>
    %17 = vector.multi_reduction <add>, %16, %cst_13 [0] : vector<16x16xf32> to vector<16xf32>
    %18 = vector.shape_cast %17 : vector<16xf32> to vector<1x16xf32>
    %19 = arith.addf %15, %18 : vector<1x16xf32>
    %c0_14 = arith.constant 0 : index
    %c1_15 = arith.constant 1 : index
    %c0_16 = arith.constant 0 : index
    %20 = vector.load %arg4[%c0_14, %c1_15, %c0_16] : memref<1x2x16xf32, #tpu.memory_space<vmem>>, vector<1x1x16xf32>
    %21 = vector.shape_cast %20 : vector<1x1x16xf32> to vector<1x16xf32>
    %22 = vector.shape_cast %19 : vector<1x16xf32> to vector<1x1x16xf32>
    tpu.vector_store %arg4[%c0_14, %c1_15, %c0_16], %22 {strides = array<i32>} : memref<1x2x16xf32, #tpu.memory_space<vmem>>, vector<1x1x16xf32>,
    return
  }
  func.func @transform_0(%arg0: i32, %arg1: i32) -> (i32, i32) {
    %c1_i32 = arith.constant 1 : i32
    %0 = arith.muli %arg0, %c1_i32 : i32
    %1 = arith.addi %0, %arg1 : i32
    %c0_i32 = arith.constant 0 : i32
    %2 = arith.minsi %1, %c0_i32 : i32
    %c0_i32_0 = arith.constant 0 : i32
    %c0_i32_1 = arith.constant 0 : i32
    return %2, %c0_i32_0 : i32, i32
  }
  func.func @transform_1(%arg0: i32, %arg1: i32) -> (i32, i32) {
    %c0_i32 = arith.constant 0 : i32
    %c0_i32_0 = arith.constant 0 : i32
    %c0_i32_1 = arith.constant 0 : i32
    return %c0_i32, %c0_i32_0 : i32, i32
  }
  func.func @transform_2(%arg0: i32, %arg1: i32) -> (i32, i32, i32) {
    %c0_i32 = arith.constant 0 : i32
    %c0_i32_0 = arith.constant 0 : i32
    %c0_i32_1 = arith.constant 0 : i32
    return %arg0, %c0_i32, %c0_i32_0 : i32, i32, i32
  }
}

module attributes {stable_mosaic.version = 11 : i64} {
  func.func @_netvlad_main_kernel(%arg0: i32, %arg1: i32, %arg2: memref<2x16xf32, #tpu.memory_space<vmem>>, %arg3: memref<1x8x128xbf16, #tpu.memory_space<vmem>>, %arg4: memref<128x16xbf16, #tpu.memory_space<vmem>>, %arg5: memref<16x128xf32, #tpu.memory_space<vmem>>, %arg6: memref<1x16x128xf32, #tpu.memory_space<vmem>>, %arg7: memref<16x128xf32, #tpu.memory_space<vmem>>, %arg8: memref<1x16xf32, #tpu.memory_space<vmem>>) attributes {dimension_semantics = [#tpu.dimension_semantics<parallel>, #tpu.dimension_semantics<arbitrary>], iteration_bounds = array<i64: 2, 1>, scalar_prefetch = 0 : i64, scratch_operands = 2 : i64, tpu.core_type = #tpu.core_type<tc>, window_params = [{pipeline_mode = #tpu.pipeline_mode<synchronous>, transform_indices = @transform_0, window_bounds = array<i64: 2, 16>}, {transform_indices = @transform_1, window_bounds = array<i64: 1, 8, 128>}, {pipeline_mode = #tpu.pipeline_mode<synchronous>, transform_indices = @transform_2, window_bounds = array<i64: 128, 16>}, {pipeline_mode = #tpu.pipeline_mode<synchronous>, transform_indices = @transform_3, window_bounds = array<i64: 16, 128>}, {transform_indices = @transform_4, window_bounds = array<i64: 1, 16, 128>}]} {
    %c0_i32 = arith.constant 0 : i32
    %0 = arith.cmpi eq, %arg1, %c0_i32 : i32
    %1 = arith.extui %0 : i1 to i32
    %c0_i32_0 = arith.constant 0 : i32
    %2 = arith.cmpi ne, %1, %c0_i32_0 : i32
    scf.if %2 {
      %cst_22 = arith.constant 0.000000e+00 : f32
      %36 = vector.broadcast %cst_22 : f32 to vector<16x128xf32>
      %c0_23 = arith.constant 0 : index
      %c0_24 = arith.constant 0 : index
      %37 = vector.load %arg7[%c0_23, %c0_24] : memref<16x128xf32, #tpu.memory_space<vmem>>, vector<16x128xf32>
      tpu.vector_store %arg7[%c0_23, %c0_24], %36 {strides = array<i32>} : memref<16x128xf32, #tpu.memory_space<vmem>>, vector<16x128xf32>,
      %cst_25 = arith.constant 0.000000e+00 : f32
      %38 = vector.broadcast %cst_25 : f32 to vector<1x16xf32>
      %c0_26 = arith.constant 0 : index
      %c0_27 = arith.constant 0 : index
      %39 = vector.load %arg8[%c0_26, %c0_27] : memref<1x16xf32, #tpu.memory_space<vmem>>, vector<1x16xf32>
      tpu.vector_store %arg8[%c0_26, %c0_27], %38 {strides = array<i32>} : memref<1x16xf32, #tpu.memory_space<vmem>>, vector<1x16xf32>,
    } else {
    }
    %c0 = arith.constant 0 : index
    %c0_1 = arith.constant 0 : index
    %c0_2 = arith.constant 0 : index
    %3 = vector.load %arg3[%c0, %c0_1, %c0_2] : memref<1x8x128xbf16, #tpu.memory_space<vmem>>, vector<1x8x128xbf16>
    %4 = vector.shape_cast %3 : vector<1x8x128xbf16> to vector<8x128xbf16>
    %c0_3 = arith.constant 0 : index
    %c0_4 = arith.constant 0 : index
    %5 = vector.load %arg4[%c0_3, %c0_4] : memref<128x16xbf16, #tpu.memory_space<vmem>>, vector<128x16xbf16>
    %cst = arith.constant dense<0.000000e+00> : vector<8x16xf32>
    %6 = tpu.matmul %4, %5, %cst {dimension_numbers = #tpu.dot_dimension_numbers<[1], [0], [0], [1], [0, 0, 1, 1], [], []>} : vector<8x128xbf16>, vector<128x16xbf16>, vector<8x16xf32> -> vector<8x16xf32>
    %c0_5 = arith.constant 0 : index
    %c0_6 = arith.constant 0 : index
    %7 = vector.load %arg2[%c0_5, %c0_6] : memref<2x16xf32, #tpu.memory_space<vmem>>, vector<1x16xf32>
    %c1 = arith.constant 1 : index
    %c0_7 = arith.constant 0 : index
    %8 = vector.load %arg2[%c1, %c0_7] : memref<2x16xf32, #tpu.memory_space<vmem>>, vector<1x16xf32>
    %9 = vector.broadcast %7 : vector<1x16xf32> to vector<8x16xf32>
    %10 = arith.subf %6, %9 : vector<8x16xf32>
    %11 = vector.broadcast %8 : vector<1x16xf32> to vector<8x16xf32>
    %12 = arith.mulf %10, %11 : vector<8x16xf32>
    %cst_8 = arith.constant dense<0xFF800000> : vector<8xf32>
    %13 = vector.multi_reduction <maximumf>, %12, %cst_8 [1] : vector<8x16xf32> to vector<8xf32>
    %14 = vector.shape_cast %13 : vector<8xf32> to vector<8x1xf32>
    %15 = vector.broadcast %14 : vector<8x1xf32> to vector<8x16xf32>
    %16 = arith.subf %12, %15 : vector<8x16xf32>
    %17 = math.exp %16 : vector<8x16xf32>
    %cst_9 = arith.constant dense<0.000000e+00> : vector<8xf32>
    %18 = vector.multi_reduction <add>, %17, %cst_9 [1] : vector<8x16xf32> to vector<8xf32>
    %19 = vector.shape_cast %18 : vector<8xf32> to vector<8x1xf32>
    %20 = tpu.reciprocal %19 {approx = true} : vector<8x1xf32> -> vector<8x1xf32>
    %21 = vector.broadcast %20 : vector<8x1xf32> to vector<8x16xf32>
    %22 = arith.mulf %17, %21 : vector<8x16xf32>
    %c0_10 = arith.constant 0 : index
    %c0_11 = arith.constant 0 : index
    %23 = vector.load %arg8[%c0_10, %c0_11] : memref<1x16xf32, #tpu.memory_space<vmem>>, vector<1x16xf32>
    %cst_12 = arith.constant dense<0.000000e+00> : vector<16xf32>
    %24 = vector.multi_reduction <add>, %22, %cst_12 [0] : vector<8x16xf32> to vector<16xf32>
    %25 = vector.shape_cast %24 : vector<16xf32> to vector<1x16xf32>
    %26 = arith.addf %23, %25 : vector<1x16xf32>
    %c0_13 = arith.constant 0 : index
    %c0_14 = arith.constant 0 : index
    %27 = vector.load %arg8[%c0_13, %c0_14] : memref<1x16xf32, #tpu.memory_space<vmem>>, vector<1x16xf32>
    tpu.vector_store %arg8[%c0_13, %c0_14], %26 {strides = array<i32>} : memref<1x16xf32, #tpu.memory_space<vmem>>, vector<1x16xf32>,
    %c0_15 = arith.constant 0 : index
    %c0_16 = arith.constant 0 : index
    %28 = vector.load %arg7[%c0_15, %c0_16] : memref<16x128xf32, #tpu.memory_space<vmem>>, vector<16x128xf32>
    %29 = arith.truncf %22 : vector<8x16xf32> to vector<8x16xbf16>
    %cst_17 = arith.constant dense<0.000000e+00> : vector<16x128xf32>
    %30 = tpu.matmul %29, %4, %cst_17 {dimension_numbers = #tpu.dot_dimension_numbers<[0], [0], [1], [1], [0, 1, 1, 1], [], []>} : vector<8x16xbf16>, vector<8x128xbf16>, vector<16x128xf32> -> vector<16x128xf32>
    %31 = arith.addf %28, %30 : vector<16x128xf32>
    %c0_18 = arith.constant 0 : index
    %c0_19 = arith.constant 0 : index
    %32 = vector.load %arg7[%c0_18, %c0_19] : memref<16x128xf32, #tpu.memory_space<vmem>>, vector<16x128xf32>
    tpu.vector_store %arg7[%c0_18, %c0_19], %31 {strides = array<i32>} : memref<16x128xf32, #tpu.memory_space<vmem>>, vector<16x128xf32>,
    %c0_i32_20 = arith.constant 0 : i32
    %33 = arith.cmpi eq, %arg1, %c0_i32_20 : i32
    %34 = arith.extui %33 : i1 to i32
    %c0_i32_21 = arith.constant 0 : i32
    %35 = arith.cmpi ne, %34, %c0_i32_21 : i32
    scf.if %35 {
      %c0_22 = arith.constant 0 : index
      %c0_23 = arith.constant 0 : index
      %36 = vector.load %arg8[%c0_22, %c0_23] : memref<1x16xf32, #tpu.memory_space<vmem>>, vector<1x16xf32>
      %37 = tpu.transpose %36, [1, 0] : vector<1x16xf32> -> vector<16x1xf32>
      %c0_24 = arith.constant 0 : index
      %c0_25 = arith.constant 0 : index
      %38 = vector.load %arg7[%c0_24, %c0_25] : memref<16x128xf32, #tpu.memory_space<vmem>>, vector<16x128xf32>
      %c0_26 = arith.constant 0 : index
      %c0_27 = arith.constant 0 : index
      %39 = vector.load %arg5[%c0_26, %c0_27] : memref<16x128xf32, #tpu.memory_space<vmem>>, vector<16x128xf32>
      %40 = vector.broadcast %37 : vector<16x1xf32> to vector<16x128xf32>
      %41 = arith.mulf %40, %39 : vector<16x128xf32>
      %42 = arith.subf %38, %41 : vector<16x128xf32>
      %43 = arith.mulf %42, %42 : vector<16x128xf32>
      %cst_28 = arith.constant dense<0.000000e+00> : vector<16xf32>
      %44 = vector.multi_reduction <add>, %43, %cst_28 [1] : vector<16x128xf32> to vector<16xf32>
      %45 = vector.shape_cast %44 : vector<16xf32> to vector<16x1xf32>
      %cst_29 = arith.constant 1.000000e-24 : f32
      %46 = vector.broadcast %cst_29 : f32 to vector<16x1xf32>
      %47 = arith.maximumf %45, %46 : vector<16x1xf32>
      %48 = math.rsqrt %47 : vector<16x1xf32>
      %49 = arith.mulf %45, %48 : vector<16x1xf32>
      %50 = arith.mulf %49, %48 : vector<16x1xf32>
      %51 = vector.shape_cast %50 : vector<16x1xf32> to vector<1x16x1xf32>
      %cst_30 = arith.constant dense<0.000000e+00> : vector<1xf32>
      %52 = vector.multi_reduction <add>, %51, %cst_30 [1, 2] : vector<1x16x1xf32> to vector<1xf32>
      %53 = vector.shape_cast %52 : vector<1xf32> to vector<1x1x1xf32>
      %54 = vector.extract %53[0, 0, 0] : f32 from vector<1x1x1xf32>
      %55 = vector.broadcast %54 : f32 to vector<1x1xf32>
      %cst_31 = arith.constant 1.000000e-24 : f32
      %56 = vector.broadcast %cst_31 : f32 to vector<1x1xf32>
      %57 = arith.maximumf %55, %56 : vector<1x1xf32>
      %58 = math.rsqrt %57 : vector<1x1xf32>
      %59 = vector.broadcast %58 : vector<1x1xf32> to vector<16x1xf32>
      %60 = arith.mulf %48, %59 : vector<16x1xf32>
      %61 = vector.broadcast %60 : vector<16x1xf32> to vector<16x128xf32>
      %62 = arith.mulf %42, %61 : vector<16x128xf32>
      %c0_32 = arith.constant 0 : index
      %c0_33 = arith.constant 0 : index
      %c0_34 = arith.constant 0 : index
      %63 = vector.load %arg6[%c0_32, %c0_33, %c0_34] : memref<1x16x128xf32, #tpu.memory_space<vmem>>, vector<1x16x128xf32>
      %64 = vector.shape_cast %63 : vector<1x16x128xf32> to vector<16x128xf32>
      %65 = vector.shape_cast %62 : vector<16x128xf32> to vector<1x16x128xf32>
      tpu.vector_store %arg6[%c0_32, %c0_33, %c0_34], %65 {strides = array<i32>} : memref<1x16x128xf32, #tpu.memory_space<vmem>>, vector<1x16x128xf32>,
    } else {
    }
    return
  }
  func.func @transform_0(%arg0: i32, %arg1: i32) -> (i32, i32) {
    %c0_i32 = arith.constant 0 : i32
    %c0_i32_0 = arith.constant 0 : i32
    %c0_i32_1 = arith.constant 0 : i32
    return %c0_i32, %c0_i32_0 : i32, i32
  }
  func.func @transform_1(%arg0: i32, %arg1: i32) -> (i32, i32, i32) {
    %c0_i32 = arith.constant 0 : i32
    %c0_i32_0 = arith.constant 0 : i32
    return %arg0, %arg1, %c0_i32 : i32, i32, i32
  }
  func.func @transform_2(%arg0: i32, %arg1: i32) -> (i32, i32) {
    %c0_i32 = arith.constant 0 : i32
    %c0_i32_0 = arith.constant 0 : i32
    %c0_i32_1 = arith.constant 0 : i32
    return %c0_i32, %c0_i32_0 : i32, i32
  }
  func.func @transform_3(%arg0: i32, %arg1: i32) -> (i32, i32) {
    %c0_i32 = arith.constant 0 : i32
    %c0_i32_0 = arith.constant 0 : i32
    %c0_i32_1 = arith.constant 0 : i32
    return %c0_i32, %c0_i32_0 : i32, i32
  }
  func.func @transform_4(%arg0: i32, %arg1: i32) -> (i32, i32, i32) {
    %c0_i32 = arith.constant 0 : i32
    %c0_i32_0 = arith.constant 0 : i32
    %c0_i32_1 = arith.constant 0 : i32
    return %arg0, %c0_i32, %c0_i32_0 : i32, i32, i32
  }
}

</mosaic_0001>

<bundles_post_ra>
// kernel: netvlad_forward.2
= control target key start
LH: loop header
LB: loop body
LE: loop exit
PB: predicated region body
PF: predicated region fallthrough
CT: control target
= control target key end

     0   :  { %v250_v0 = vmov 0.0   ;;  %vm251_vm0 = vmmov 0   ;;  %vm48_vm1 = vcmask 123904   ;;  %vm164_vm2 = vcmask 130048   ;;  %s309_s1 = inlined_call_operand.vmem [shape: bf16[128,16], index: 1, kind: input, shape index: {}]   ;;  %s310_s0 = inlined_call_operand.vmem [shape: bf16[16,128], index: 0, kind: input, shape index: {}]   ;;  %s311_s2 = inlined_call_operand.vmem [shape: f32[1,2,16], index: 2, kind: output, shape index: {}]  }
   0x1   :  { %219 = vmatprep.subr.bf16.mxu0 %v250_v0  ;;  %v241_v1 = vld [vmem:[%s309_s1] sm:$0xff]   ;;  %235 = vmatprep.mubr.msk.bf16.mxu0 %vm251_vm0, %v250_v0  ;;  %v242_v2 = vld [vmem:[%s309_s1 + $0x8] sm:$0xff]   ;;  %v243_v3 = vld [vmem:[%s309_s1 + $0x10] sm:$0xff]   ;;  %49 = vst.msk [vmem:[%s311_s2] sm:$0x3] %vm48_vm1, %v250_v0  ;;  %vm175_vm3 = vcmask 122880  }
   0x2   :  { %220 = vmatpush3.bf16.msra.mxu0 %v241_v1  ;;  %v244_v4 = vld [vmem:[%s309_s1 + $0x18] sm:$0xff]   ;;  %v245_v5 = vld [vmem:[%s309_s1 + $0x20] sm:$0xff]   ;;  %v246_v6 = vld [vmem:[%s309_s1 + $0x28] sm:$0xff]  }
   0x3   :  { %221 = vmatprep.subr.bf16.mxu0 %v250_v0  ;;  %v247_v7 = vld [vmem:[%s309_s1 + $0x30] sm:$0xff]   ;;  %v248_v8 = vld [vmem:[%s309_s1 + $0x38] sm:$0xff]   ;;  %v249_v9 = vld [vmem:[%s310_s0] sm:$0xff]  }
   0x6   :  { %222 = vmatpush3.bf16.msra.mxu0 %v242_v2 }
   0x7   :  { %223 = vmatprep.subr.bf16.mxu0 %v250_v0 }
   0x8   :  { %v163_v31 = vld [vmem:[%s311_s2] sm:$0x1]  ;;  %v177_v34 = vld [vmem:[%s311_s2 + $0x1] sm:$0x1] }
   0xa   :  { %224 = vmatpush3.bf16.msra.mxu0 %v243_v3 }
   0xb   :  { %225 = vmatprep.subr.bf16.mxu0 %v250_v0 }
   0xe   :  { %226 = vmatpush3.bf16.msra.mxu0 %v244_v4 }
   0xf   :  { %227 = vmatprep.subr.bf16.mxu0 %v250_v0 }
  0x12   :  { %228 = vmatpush3.bf16.msra.mxu0 %v245_v5 }
  0x13   :  { %229 = vmatprep.subr.bf16.mxu0 %v250_v0 }
  0x16   :  { %230 = vmatpush3.bf16.msra.mxu0 %v246_v6 }
  0x17   :  { %231 = vmatprep.subr.bf16.mxu0 %v250_v0 }
  0x1a   :  { %232 = vmatpush3.bf16.msra.mxu0 %v247_v7 }
  0x1b   :  { %233 = vmatprep.subr.bf16.mxu0 %v250_v0 }
  0x1e   :  { %234 = vmatpush3.bf16.msra.mxu0 %v248_v8 }
  0x21   :  { %236 = vmatmul.mubr.bf16.vlgmr.msra.gmra.mrb[0].mxu0 %v249_v9 }
  0xf4   :  { %v156_v10 = vpop.f32.mrb[0].mxu0 }
  0xf5   :  { %v178_v11 = vmul.f32 %v156_v10, %v156_v10  ;;  %v237_v12 = vpop.f32.mrb[1].mxu0  ;;  %v165_v14 = vsel %vm164_vm2, %v156_v10, 0.0 }
  0xf6   :  { %v159_v13 = vpop.f32.mrb[2].mxu0 }
  0xf7   :  { %v166_v15 = vsel %vm164_vm2, %v159_v13, 0.0  ;;  %v179_v16 = vmul.f32 %v159_v13, %v159_v13  ;;  %v238_v17 = vpop.f32.mrb[3].mxu0  ;;  %v180_v19 = vsel %vm164_vm2, %v178_v11, 0.0 }
  0xf8   :  { %v167_v18 = vadd.f32 %v166_v15, %v165_v14 }
  0xf9   :  { %v181_v20 = vsel %vm164_vm2, %v179_v16, 0.0 }
  0xfa   :  { %v168_v21 = vrot.slane %v167_v18, 4  ;;  %v182_v22 = vadd.f32 %v181_v20, %v180_v19 }
  0xfc   :  { %v169_v23 = vadd.f32 %v168_v21, %v167_v18  ;;  %v183_v24 = vrot.slane %v182_v22, 4 }
  0xfe   :  { %v170_v25 = vrot.slane %v169_v23, 2  ;;  %v184_v26 = vadd.f32 %v183_v24, %v182_v22 }
 0x100   :  { %v171_v27 = vadd.f32 %v170_v25, %v169_v23  ;;  %v185_v28 = vrot.slane %v184_v26, 2 }
 0x102   :  { %v172_v29 = vrot.slane %v171_v27, 1  ;;  %v186_v30 = vadd.f32 %v185_v28, %v184_v26 }
 0x104   :  { %v173_v32 = vadd.f32 %v172_v29, %v171_v27  ;;  %v187_v33 = vrot.slane %v186_v30, 1 }
 0x106   :  { %v174_v35 = vadd.f32 %v173_v32, %v163_v31  ;;  %v188_v36 = vadd.f32 %v187_v33, %v186_v30 }
 0x108   :  { %176 = vst.msk [vmem:[%s311_s2] sm:$0x1] %vm175_vm3, %v174_v35  ;;  %v189_v37 = vadd.f32 %v188_v36, %v177_v34 }
 0x10a   :  { %190 = vst.msk [vmem:[%s311_s2 + $0x1] sm:$0x1] %vm175_vm3, %v189_v37 }

// kernel: netvlad_forward.3
= control target key start
LH: loop header
LB: loop body
LE: loop exit
PB: predicated region body
PF: predicated region fallthrough
CT: control target
= control target key end

     0   :  { %s755_s15 = smov 0   ;;  %s757_s16 = smov 0   ;;  %s837_s0 = inlined_call_operand.vmem [shape: f32[2,16], index: 0, kind: input, shape index: {}]   ;;  %s838_s1 = inlined_call_operand.vmem [shape: bf16[2,8,128], index: 1, kind: input, shape index: {}]   ;;  %s839_s2 = inlined_call_operand.vmem [shape: bf16[128,16], index: 2, kind: input, shape index: {}]   ;;  %s840_s3 = inlined_call_operand.vmem [shape: f32[16,128], index: 3, kind: input, shape index: {}]   ;;  %s841_s4 = inlined_call_operand.vmem [shape: f32[2,16,128], index: 4, kind: output, shape index: {}]  }
   0x1   :  { %s759_s17 = smov 0  }
   0x2 LB: > { %s26_s18 = sadd.s32 1, %s721_s16  ;;  %p599_p0 = scmp.ge.s32.totalorder %s725_s17, 1  ;;  %s725_s17 = sphi %s759_s17, %s14_s17   ;;  %s721_s16 = sphi %s757_s16, %s843_s16   ;;  %s717_s15 = sphi %s755_s15, %s842_s15  }
   0x3   : > { %p28_p1 = scmp.ge.s32.totalorder %s26_s18, 2  ;;  %p178_p2 = scmp.lt.s32.totalorder %s725_s17, 3 }
   0x5   : > { %s845_s18 = smov (%p28_p1, %s26_s18), 0  ;;  %p179_p3 = pnand %p599_p0, %p178_p2 }
   0x6   : > { %v685_v0 = vld [vmem:[%s839_s2] sm:$0xff] (!%p179_p3)   ;;  %v727_v1 = vmov (!%p179_p3), 0.0   ;;  %v686_v2 = vld [vmem:[%s839_s2 + $0x8] sm:$0xff] (!%p179_p3)   ;;  %vm728_vm0 = vmmov (!%p179_p3), 0   ;;  %v687_v3 = vld [vmem:[%s839_s2 + $0x10] sm:$0xff] (!%p179_p3)   ;;  %p206_p4 = scmp.lt.s32.totalorder (!%p179_p3), %s717_s15, 1 }
   0x7   : > { %182 = sbr.rel (%p179_p3) target bundleno = 1277 (0x4fd), region = 36  ;;  %628 = vmatprep.subr.bf16.mxu0 (!%p179_p3), %v727_v1  ;;  %648 = vmatprep.subr.bf16.mxu1 (!%p179_p3), %v727_v1  ;;  %v688_v4 = vld [vmem:[%s839_s2 + $0x18] sm:$0xff] (!%p179_p3)   ;;  %v689_v5 = vld [vmem:[%s839_s2 + $0x20] sm:$0xff] (!%p179_p3)   ;;  %v690_v6 = vld [vmem:[%s839_s2 + $0x28] sm:$0xff] (!%p179_p3)   ;;  %vm344_vm1 = vcmask (!%p179_p3), 130048   ;;  %vm225_vm2 = vcmask (!%p179_p3), 122880  }
   0x8   : > { %629 = vmatpush3.bf16.msra.mxu0 (!%p179_p3), %v685_v0  ;;  %644 = vmatprep.mubr.msk.bf16.mxu0 (!%p179_p3), %vm728_vm0, %v727_v1  ;;  %v691_v7 = vld [vmem:[%s839_s2 + $0x30] sm:$0xff] (!%p179_p3)   ;;  %v692_v8 = vld [vmem:[%s839_s2 + $0x38] sm:$0xff] (!%p179_p3)   ;;  %v611_v10 = vld [vmem:[%s837_s0] ss:$0 sm:$0xff] (!%p179_p3)  ;;  %226 = vst.msk [vmem:[#allocation3] sm:$0x1] (!%p179_p3), %vm225_vm2, %v727_v1 }
   0x9   : > { %630 = vmatprep.subr.bf16.mxu0 (!%p179_p3), %v727_v1  ;;  %650 = vmatprep.mubr.msk.bf16.mxu1 (!%p179_p3), %vm728_vm0, %v727_v1  ;;  %v612_v12 = vld [vmem:[%s837_s0 + $0x1] ss:$0 sm:$0xff] (!%p179_p3)  ;;  %vm390_vm3 = vcmask (!%p179_p3), 1043456   ;;  %v729_v25 = vmov (!%p179_p3), 0   ;;  %vm386_vm4 = vcmask (!%p179_p3), 64512   ;;  %v478_v45 = vld [vmem:[%s840_s3 + $0x8] sm:$0xff] (!%p179_p3) }
   0xa   : > { %683 = vset.pattern.permute.xlu0 (!%p179_p3), %v729_v25  ;;  %v477_v43 = vld [vmem:[%s840_s3] sm:$0xff] (!%p179_p3)  ;;  %vm507_vm5 = vcmask (!%p179_p3), 7168  }
   0xc   : > { %631 = vmatpush3.bf16.msra.mxu0 (!%p179_p3), %v686_v2 }
   0xd   : > { %632 = vmatprep.subr.bf16.mxu0 (!%p179_p3), %v727_v1 }
   0xe   : > { %s847_s15 = smov (!%p206_p4, %s717_s15), 1 }
   0xf   : > { %s600_s7 = sshll.u32 %s847_s15, 2  ;;  %v356_v36 = vld [vmem:[#allocation3] sm:$0x1]  ;;  %s616_s26 = sshll.u32 %s847_s15, 4 }
  0x10   : > { %633 = vmatpush3.bf16.msra.mxu0 %v687_v3  ;;  %s212_s12 = scalar_lea.vmem %s838_s1, %s600_s7  ;;  %s217_s29 = scalar_lea.vmem %s841_s4, %s616_s26 }
  0x11   : > { %634 = vmatprep.subr.bf16.mxu0 %v727_v1  ;;  %v227_v9 = vld [vmem:[%s212_s12] sm:$0xf] }
  0x12   : > { %v392_v24 = vsel %vm390_vm3, %v227_v9, 0 }
  0x13   : > { %649 = vmatpush3.bf16.msra.mxu1 %v392_v24 }
  0x14   : > { %635 = vmatpush3.bf16.msra.mxu0 %v688_v4 }
  0x15   : > { %636 = vmatprep.subr.bf16.mxu0 %v727_v1 }
  0x18   : > { %637 = vmatpush3.bf16.msra.mxu0 %v689_v5 }
  0x19   : > { %638 = vmatprep.subr.bf16.mxu0 %v727_v1 }
  0x1c   : > { %639 = vmatpush3.bf16.msra.mxu0 %v690_v6 }
  0x1d   : > { %640 = vmatprep.subr.bf16.mxu0 %v727_v1 }
  0x20   : > { %641 = vmatpush3.bf16.msra.mxu0 %v691_v7 }
  0x21   : > { %642 = vmatprep.subr.bf16.mxu0 %v727_v1 }
  0x24   : > { %643 = vmatpush3.bf16.msra.mxu0 %v692_v8 }
  0x27   : > { %645 = vmatmul.mubr.bf16.vlgmr.msra.gmra.mrb[0].mxu0 %v227_v9 }
  0xfa   : > { %v326_v11 = vpop.f32.mrb[0].mxu0 }
  0xfb   : > { %v338_v13 = vsub.f32 %v326_v11, %v611_v10  ;;  %v646_v14 = vpop.f32.mrb[1].mxu0 }
  0xfc   : > { %v329_v15 = vpop.f32.mrb[2].mxu0 }
  0xfd   : > { %v647_v16 = vpop.f32.mrb[3].mxu0  ;;  %v343_v17 = vmul.f32 %v612_v12, %v338_v13 }
  0xff   : > { %v345_v18 = vsel %vm344_vm1, %v343_v17, -inf }
 0x100   : > { %346 = vmax.xlane.f32.xlu0 %v345_v18 }
 0x18d   : > { %v347_v19 = vpop.xlane.xlu0 %346 }
 0x18e   : > { %v348_v20 = vsub.f32 %v343_v17, %v347_v19 }
 0x190   : > { %v349_v21 = vmul.f32 1.442695, %v348_v20 }
 0x192   : > { %693 = vpow2.f32 %v349_v21 }
 0x19c   : > { %v694_v22 = vpop.eup %693 }
 0x19d   : > { %v351_v23 = vsel %vm344_vm1, %v694_v22, 0.0 }
 0x19e   : > { %352 = vadd.xlane.f32.xlu0 %v351_v23 }
 0x22b   : > { %v353_v26 = vpop.xlane.xlu0 %352 }
 0x22c   : > { %695 = vrcp.f32 %v353_v26 }
 0x236   : > { %v696_v27 = vpop.eup %695 }
 0x237   : > { %v355_v28 = vmul.f32 %v696_v27, %v694_v22 }
 0x239   : > { %v369_v29 = vpack.c.bf16 %v355_v28, %v355_v28  ;;  %v357_v30 = vsel %vm344_vm1, %v355_v28, 0.0 }
 0x23a   : > { %v358_v31 = vrot.slane %v357_v30, 4 }
 0x23b   : > { %370 = vxpose.xlu1.c.b16.start.end [1/1] (short) (narrow) %v369_v29, 16 }
 0x23c   : > { %v359_v32 = vadd.f32 %v358_v31, %v357_v30 }
 0x23e   : > { %v360_v33 = vrot.slane %v359_v32, 2 }
 0x240   : > { %v361_v34 = vadd.f32 %v360_v33, %v359_v32 }
 0x242   : > { %v362_v35 = vrot.slane %v361_v34, 1 }
 0x244   : > { %v363_v37 = vadd.f32 %v362_v35, %v361_v34 }
 0x246   : > { %v364_v38 = vadd.f32 %v363_v37, %v356_v36 }
 0x248   : > { %366 = vst.msk [vmem:[#allocation3] sm:$0x1] %vm225_vm2, %v364_v38 }
 0x24f   : > { %v442_v39 = vld [vmem:[#allocation3] sm:$0x1] }
 0x250   : > { %443 = vxpose.xlu1.b32.start.end [1/1] (short) (narrow) %v442_v39, 16 }
 0x26e   : > { %684 = vset.pattern.permute.xlu1 %v729_v25 }
 0x2a1   : > { %v378_v40 = vpop.trf.xlu1 }
 0x2a2   : > { %651 = vmatmul.mubr.msk.bf16.vlgmr.msra.gmra.mrb[0].mxu1 %vm386_vm4, %v378_v40 }
 0x2d0   : > { %v459_v41 = vpop.trf.xlu1 }
 0x2d1   : > { %481 = vperm.xlu0 %683, %v459_v41  }
 0x2d4   : > { %v460_v42 = vpop.trf.xlu1 }
 0x2d5   : > { %486 = vperm.xlu1 %684, %v460_v42  }
 0x350   : > { %v482_v44 = vpop.permute.xlu0 %481 }
 0x351   : > { %v489_v47 = vmul.f32 %v482_v44, %v477_v43 }
 0x354   : > { %v487_v46 = vpop.permute.xlu1 %486 }
 0x355   : > { %v490_v48 = vmul.f32 %v487_v46, %v478_v45 }
 0x375   : > { %v428_v49 = vpop.f32.mrb[0].mxu1 }
 0x376   : > { %v491_v50 = vsub.f32 %v428_v49, %v489_v47  ;;  %v652_v51 = vpop.f32.mrb[1].mxu1 }
 0x377   : > { %v431_v52 = vpop.f32.mrb[2].mxu1 }
 0x378   : > { %v492_v53 = vsub.f32 %v431_v52, %v490_v48  ;;  %v653_v54 = vpop.f32.mrb[3].mxu1  ;;  %v493_v55 = vmul.f32 %v491_v50, %v491_v50 }
 0x37a   : > { %495 = vadd.xlane.f32.xlu1 %v493_v55  ;;  %v494_v56 = vmul.f32 %v492_v53, %v492_v53 }
 0x37c   : > { %497 = vadd.xlane.f32.xlu0 %v494_v56 }
 0x407   : > { %v496_v57 = vpop.xlane.xlu1 %495 }
 0x408   : > { %v499_v58 = vmax.f32 %v496_v57, 1e-24 }
 0x409   : > { %v498_v59 = vpop.xlane.xlu0 %497 }
 0x40a   : > { %697 = vrsqrt.f32 %v499_v58  ;;  %v500_v60 = vmax.f32 %v498_v59, 1e-24 }
 0x40c   : > { %699 = vrsqrt.f32 %v500_v60 }
 0x414   : > { %v698_v61 = vpop.eup %697 }
 0x415   : > { %v503_v62 = vmul.f32 %v698_v61, %v496_v57 }
 0x416   : > { %v700_v63 = vpop.eup %699 }
 0x417   : > { %v505_v0 = vmul.f32 %v698_v61, %v503_v62  ;;  %v504_v1 = vmul.f32 %v700_v63, %v498_v59 }
 0x419   : > { %v506_v2 = vmul.f32 %v700_v63, %v504_v1  ;;  %v508_v3 = vsel %vm507_vm5, %v505_v0, 0.0 }
 0x41b   : > { %v509_v4 = vsel %vm507_vm5, %v506_v2, 0.0 }
 0x41c   : > { %v510_v5 = vadd.f32 %v509_v4, %v508_v3 }
 0x41e   : > { %511 = vadd.xlane.f32.xlu0 %v510_v5 }
 0x4ab   : > { %v512_v6 = vpop.xlane.xlu0 %511 }
 0x4ac   : > { %v513_v7 = vrot.slane %v512_v6, 4 }
 0x4ae   : > { %v514_v8 = vadd.f32 %v513_v7, %v512_v6 }
 0x4b0   : > { %v515_v9 = vrot.slane %v514_v8, 2 }
 0x4b2   : > { %v516_v10 = vadd.f32 %v515_v9, %v514_v8 }
 0x4b4   : > { %v517_v11 = vrot.slane %v516_v10, 1 }
 0x4b6   : > { %v518_v12 = vadd.f32 %v517_v11, %v516_v10 }
 0x4b8   : > { %654 = vpush %v518_v12 }
 0x4e9   : > { %s655_s25 = spop %654 }
 0x4ea   : > { %v520_v13 = vstv %s655_s25 }
 0x4eb   : > { %v521_v14 = vmax.f32 %v520_v13, 1e-24 }
 0x4ed   : > { %701 = vrsqrt.f32 %v521_v14 }
 0x4f7   : > { %v702_v15 = vpop.eup %701 }
 0x4f8   : > { %v523_v16 = vmul.f32 %v702_v15, %v698_v61  ;;  %v524_v17 = vmul.f32 %v702_v15, %v700_v63 }
 0x4fa   : > { %v525_v18 = vmul.f32 %v523_v16, %v491_v50  ;;  %v526_v19 = vmul.f32 %v524_v17, %v492_v53 }
 0x4fc   : > { %527 = vst [vmem:[%s217_s29] sm:$0xff] %v525_v18  ;;  %528 = vst [vmem:[%s217_s29 + $0x8] sm:$0xff] %v526_v19 }
 0x4fd PF: > { %s14_s17 = sadd.s32 1, %s725_s17   ;;  %s842_s15 = smov %s721_s16 }
 0x4fe   : > { %p11_p5 = scmp.ge.s32.totalorder %s14_s17, 4   ;;  %s843_s16 = smov %s845_s18 }
 0x500   :  { %13 = sbr.rel (!%p11_p5) target bundleno = 2 (0x2), region = 74 }

</bundles_post_ra>
